<compile_context>
chip_gen: v5e
topology: v5e:2x2
jax: 0.10.0
libtpu: 0.0.40
codegen_flags: <defaults>
</compile_context>

<pallas_src>
import functools

import jax
import jax.numpy as jnp
from jax.experimental import pallas as pl
from jax.experimental.pallas import tpu as pltpu

SUB = 8      # sublane quantum
LANES = 128  # lane quantum


def _round_up(x, m):
    return -(-x // m) * m


def init_params(key, num_states, num_actions, hidden_size):
    """PyTorch-default-style init (uniform +-1/sqrt(fan_in)).
    Weights stored as (in, out) so the kernel computes x @ W; biases as (out,)."""
    def linear(k, fan_in, fan_out):
        kw, kb = jax.random.split(k)
        bound = 1.0 / jnp.sqrt(fan_in)
        w = jax.random.uniform(kw, (fan_in, fan_out), jnp.float32, -bound, bound)
        b = jax.random.uniform(kb, (fan_out,), jnp.float32, -bound, bound)
        return w, b

    k1, k2, k3 = jax.random.split(key, 3)
    w1, b1 = linear(k1, num_states, hidden_size)
    w2, b2 = linear(k2, hidden_size, hidden_size)
    w3, b3 = linear(k3, hidden_size, 2 * num_actions)
    return (w1, b1, w2, b2, w3, b3)


def pack_params(params, num_states, hidden_size, num_actions):
    """Pack everything into one lane-dense f32 slab (done once, off the hot path).

    Row layout (128 lanes wide, every block starts on an 8-row boundary):
      [0        , K1)          W1   (S x H, zero-padded)
      [K1       , K1+8)        b1 row; lane H additionally holds 1.0 (carry seed)
      [K1+8     , +K2)         W2_aug: rows 0..H-1 = W2, row H = b2, col H row H = 1.0
      [..       , +K2)         W3_aug: rows 0..H-1 = W3 (cols PERMUTED 0<-0,1<-2,2<-1,5<-3),
                               row H = b3 (same permutation)
    with K1 = round_up(S, 8) and K2 = round_up(H+1, 8).
    The carry lane H stays 1.0 through both ReLUs, so b2/b3 ride the matmuls.
    The W3/b3 permutation makes row 0 of the kernel's output tile directly hold
    [mu1_raw, mu2_raw, var1_raw, 0, 0, var2_raw, ...] = flattened diag_embed layout.
    """
    assert 2 * num_actions == 4, ".view(-1, 4) in the torch forward requires 2*num_actions == 4"
    S, H = num_states, hidden_size
    assert H < LANES, "carry lane sits at index H; need hidden_size < 128"
    K1 = _round_up(S, SUB)
    K2 = _round_up(H + 1, SUB)

    w1, b1, w2, b2, w3, b3 = params
    b1 = jnp.reshape(b1, (-1,))
    b2 = jnp.reshape(b2, (-1,))
    b3 = jnp.reshape(b3, (-1,))

    w1p = jnp.zeros((K1, LANES), jnp.float32).at[:S, :H].set(w1)
    b1p = (jnp.zeros((SUB, LANES), jnp.float32)
           .at[0, :H].set(b1)
           .at[0, H].set(1.0))                 # carry seed: relu(0*W1 + 1) == 1
    w2p = (jnp.zeros((K2, LANES), jnp.float32)
           .at[:H, :H].set(w2)
           .at[H, :H].set(b2)                  # b2 folded as carry row
           .at[H, H].set(1.0))                 # propagate carry lane
    w3p = jnp.zeros((K2, LANES), jnp.float32)
    for new_c, orig_c in ((0, 0), (1, 2), (2, 1), (5, 3)):
        w3p = w3p.at[:H, new_c].set(w3[:, orig_c]).at[H, new_c].set(b3[orig_c])

    return jnp.concatenate([w1p, b1p, w2p, w3p], axis=0)   # (K1 + 8 + 2*K2, 128)


def _policy_kernel(S, K1, K2, x_ref, p_ref, o_ref):
    nb = x_ref.shape[0]
    r_b1 = K1
    r_w2 = K1 + SUB
    r_w3 = r_w2 + K2

    x = x_ref[...].astype(jnp.float32)                       # (nb, S)
    if nb == 1:
        b1 = p_ref[r_b1:r_b1 + 1, :]                          # (1, 128)
    else:
        b1 = p_ref[pl.ds(r_b1, nb, stride=0), :]              # sublane-broadcast bias

    # Layer 1: explicit b1 add (also injects the carry 1.0 into lane H).
    h1 = jnp.maximum(
        jnp.dot(x, p_ref[0:S, :], preferred_element_type=jnp.float32) + b1, 0.0)
    # Layers 2/3: K shrunk to K2 (= H+1 rounded up); biases ride the carry lane.
    h2 = jnp.maximum(
        jnp.dot(h1[:, :K2], p_ref[r_w2:r_w2 + K2, :],
                preferred_element_type=jnp.float32), 0.0)
    o = jnp.dot(h2[:, :K2], p_ref[r_w3:r_w3 + K2, :],
                preferred_element_type=jnp.float32)

    lane = jax.lax.broadcasted_iota(jnp.int32, o.shape, 1)
    softplus = jnp.maximum(o, 0.0) + jnp.log(1.0 + jnp.exp(-jnp.abs(o)))  # stable softplus
    act = jnp.where(lane < 2, jnp.tanh(o), softplus)          # lanes 0,1: tanh -> mu
    keep = (lane < 3) | (lane == 5)                           # mu1,mu2,var1,0,0,var2
    o_ref[...] = jnp.where(keep, act, 0.0)


@jax.jit
def policy_network_forward(state, packed_params):
    """Returns (mu, cov) of the MultivariateNormal the PyTorch module builds.
    mu: (1, 1, 2)  cov: (1, 1, 2, 2) == diag_embed(var)."""
    nb, S = state.shape
    K1 = _round_up(S, SUB)
    K2 = (packed_params.shape[0] - K1 - SUB) // 2
    assert packed_params.shape == (K1 + SUB + 2 * K2, LANES)

    vmem = pl.BlockSpec(memory_space=pltpu.MemorySpace.VMEM)
    net = pl.pallas_call(
        functools.partial(_policy_kernel, S, K1, K2),
        out_shape=jax.ShapeDtypeStruct((nb, LANES), jnp.float32),
        in_specs=[vmem, vmem],
        out_specs=vmem,
    )(state, packed_params)

    # Only row 0 is consumed by the torch forward (nn_out[0]).  This slice+reshape
    # is one tiny fused XLA op; consume `net` directly downstream to shave it.
    mu = net[0, 0:2].reshape(1, 1, 2)
    cov = net[0, 2:6].reshape(1, 1, 2, 2)        # [[var1, 0], [0, var2]]
    # TODO(synk): torch.distributions.MultivariateNormal object itself has no Pallas
    # equivalent; we return its (mean, covariance) parameterization instead.
    return mu, cov


if __name__ == "__main__":
    # .view(-1, 4) in the PyTorch forward forces 2 * num_actions == 4.
    num_states, num_actions, hidden_size = 8, 2, 32
    batch = 1

    key = jax.random.PRNGKey(0)
    k_params, k_state = jax.random.split(key)
    params = init_params(k_params, num_states, num_actions, hidden_size)
    packed = pack_params(params, num_states, hidden_size, num_actions)
    state = jax.random.normal(k_state, (batch, num_states), dtype=jnp.float32)

    mu, cov = policy_network_forward(state, packed)
    jax.block_until_ready((mu, cov))

    assert mu.shape == (1, 1, 2) and cov.shape == (1, 1, 2, 2)

    # Reference check in plain JAX (matches the PyTorch forward exactly).
    w1, b1, w2, b2, w3, b3 = params
    h1 = jnp.maximum(state @ w1 + b1, 0.0)
    h2 = jnp.maximum(h1 @ w2 + b2, 0.0)
    ref_out = h2 @ w3 + b3
    mu_ref = jnp.stack([jnp.tanh(ref_out[0, 0]), jnp.tanh(ref_out[0, 2])]).reshape(1, 1, 2)
    var_ref = jnp.stack([jax.nn.softplus(ref_out[0, 1]),
                         jax.nn.softplus(ref_out[0, 3])]).reshape(1, 1, 2)
    cov_ref = var_ref[..., None] * jnp.eye(2, dtype=jnp.float32)
    assert jnp.allclose(mu, mu_ref, atol=1e-5), (mu, mu_ref)
    assert jnp.allclose(cov, cov_ref, atol=1e-5), (cov, cov_ref)

    print("KERNEL_OK")
</pallas_src>

<mosaic_0001>
module attributes {stable_mosaic.version = 11 : i64} {
  func.func @_policy_kernel(%arg0: memref<1x8xf32, #tpu.memory_space<vmem>>, %arg1: memref<96x128xf32, #tpu.memory_space<vmem>>, %arg2: memref<1x128xf32, #tpu.memory_space<vmem>>) attributes {dimension_semantics = [], scalar_prefetch = 0 : i64, scratch_operands = 0 : i64, tpu.core_type = #tpu.core_type<tc>} {
    %c0 = arith.constant 0 : index
    %c0_0 = arith.constant 0 : index
    %0 = vector.load %arg0[%c0, %c0_0] : memref<1x8xf32, #tpu.memory_space<vmem>>, vector<1x8xf32>
    %c8 = arith.constant 8 : index
    %c0_1 = arith.constant 0 : index
    %1 = vector.load %arg1[%c8, %c0_1] : memref<96x128xf32, #tpu.memory_space<vmem>>, vector<1x128xf32>
    %c0_2 = arith.constant 0 : index
    %c0_3 = arith.constant 0 : index
    %2 = vector.load %arg1[%c0_2, %c0_3] : memref<96x128xf32, #tpu.memory_space<vmem>>, vector<8x128xf32>
    %cst = arith.constant dense<0.000000e+00> : vector<1x128xf32>
    %3 = tpu.matmul %0, %2, %cst {dimension_numbers = #tpu.dot_dimension_numbers<[1], [0], [0], [1], [0, 0, 1, 1], [], []>} : vector<1x8xf32>, vector<8x128xf32>, vector<1x128xf32> -> vector<1x128xf32>
    %4 = arith.addf %3, %1 : vector<1x128xf32>
    %cst_4 = arith.constant 0.000000e+00 : f32
    %5 = vector.broadcast %cst_4 : f32 to vector<1x128xf32>
    %6 = arith.maximumf %4, %5 : vector<1x128xf32>
    %7 = vector.extract_strided_slice %6 {offsets = [0, 0], sizes = [1, 40], strides = [1, 1]} : vector<1x128xf32> to vector<1x40xf32>
    %c16 = arith.constant 16 : index
    %c0_5 = arith.constant 0 : index
    %8 = vector.load %arg1[%c16, %c0_5] : memref<96x128xf32, #tpu.memory_space<vmem>>, vector<40x128xf32>
    %cst_6 = arith.constant dense<0.000000e+00> : vector<1x128xf32>
    %9 = tpu.matmul %7, %8, %cst_6 {dimension_numbers = #tpu.dot_dimension_numbers<[1], [0], [0], [1], [0, 0, 1, 1], [], []>} : vector<1x40xf32>, vector<40x128xf32>, vector<1x128xf32> -> vector<1x128xf32>
    %cst_7 = arith.constant 0.000000e+00 : f32
    %10 = vector.broadcast %cst_7 : f32 to vector<1x128xf32>
    %11 = arith.maximumf %9, %10 : vector<1x128xf32>
    %12 = vector.extract_strided_slice %11 {offsets = [0, 0], sizes = [1, 40], strides = [1, 1]} : vector<1x128xf32> to vector<1x40xf32>
    %c56 = arith.constant 56 : index
    %c0_8 = arith.constant 0 : index
    %13 = vector.load %arg1[%c56, %c0_8] : memref<96x128xf32, #tpu.memory_space<vmem>>, vector<40x128xf32>
    %cst_9 = arith.constant dense<0.000000e+00> : vector<1x128xf32>
    %14 = tpu.matmul %12, %13, %cst_9 {dimension_numbers = #tpu.dot_dimension_numbers<[1], [0], [0], [1], [0, 0, 1, 1], [], []>} : vector<1x40xf32>, vector<40x128xf32>, vector<1x128xf32> -> vector<1x128xf32>
    %15 = tpu.iota {dimensions = array<i32: 1>} : vector<1x128xi32>
    %cst_10 = arith.constant 0.000000e+00 : f32
    %16 = vector.broadcast %cst_10 : f32 to vector<1x128xf32>
    %17 = arith.maximumf %14, %16 : vector<1x128xf32>
    %18 = math.absf %14 : vector<1x128xf32>
    %cst_11 = arith.constant 0.000000e+00 : f32
    %19 = vector.broadcast %cst_11 : f32 to vector<1x128xf32>
    %20 = arith.subf %19, %18 : vector<1x128xf32>
    %21 = math.exp %20 : vector<1x128xf32>
    %cst_12 = arith.constant 1.000000e+00 : f32
    %22 = vector.broadcast %cst_12 : f32 to vector<1x128xf32>
    %23 = arith.addf %22, %21 : vector<1x128xf32>
    %24 = math.log %23 : vector<1x128xf32>
    %25 = arith.addf %17, %24 : vector<1x128xf32>
    %c2_i32 = arith.constant 2 : i32
    %26 = vector.broadcast %c2_i32 : i32 to vector<1x128xi32>
    %27 = arith.cmpi slt, %15, %26 : vector<1x128xi32>
    %28 = math.tanh %14 : vector<1x128xf32>
    %29 = arith.select %27, %28, %25 : vector<1x128xi1>, vector<1x128xf32>
    %c3_i32 = arith.constant 3 : i32
    %30 = vector.broadcast %c3_i32 : i32 to vector<1x128xi32>
    %31 = arith.cmpi slt, %15, %30 : vector<1x128xi32>
    %c5_i32 = arith.constant 5 : i32
    %32 = vector.broadcast %c5_i32 : i32 to vector<1x128xi32>
    %33 = arith.cmpi eq, %15, %32 : vector<1x128xi32>
    %34 = arith.ori %31, %33 : vector<1x128xi1>
    %cst_13 = arith.constant 0.000000e+00 : f32
    %35 = vector.broadcast %cst_13 : f32 to vector<1x128xf32>
    %36 = arith.select %34, %29, %35 : vector<1x128xi1>, vector<1x128xf32>
    %c0_14 = arith.constant 0 : index
    %c0_15 = arith.constant 0 : index
    %37 = vector.load %arg2[%c0_14, %c0_15] : memref<1x128xf32, #tpu.memory_space<vmem>>, vector<1x128xf32>
    tpu.vector_store %arg2[%c0_14, %c0_15], %36 {strides = array<i32>} : memref<1x128xf32, #tpu.memory_space<vmem>>, vector<1x128xf32>,
    return
  }
}

</mosaic_0001>

<bundles_post_ra>
// kernel: squeeze.3
= control target key start
LH: loop header
LB: loop body
LE: loop exit
PB: predicated region body
PF: predicated region fallthrough
CT: control target
= control target key end

     0   :  { %s80_s0 = inlined_call_operand.vmem [shape: f32[4], index: 0, kind: input, shape index: {}]   ;;  %s81_s1 = inlined_call_operand.hbm [shape: f32[1,1,2,2], index: 1, kind: output, shape index: {}]  }
   0x1   :  { %v5_v0 = vld [vmem:[%s80_s0] sm:$0x1] }
   0x2   :  { %2 = vsyncpa [#allocation1], 0  ;;  %6 = vst [vmem:[#allocation3] sm:$0x1] %v5_v0  ;;  %vm8_vm0 = vcmask 15360   ;;  %s62_s0 = smov 126  }
   0x3   :  { %s63_s8 = smov [#allocation0]   ;;  %s27_s1 = sshll.u32 %s81_s1, 4  ;;  %s28_s1 = int_to_ptr.hbm [resolvable:$true] %s27_s1 }
   0x4   :  { %s25_s9 = sshll.u32 %s63_s8, 4  ;;  %s26_s9 = int_to_ptr.vmem [resolvable:$true] %s25_s9 }
   0x9   :  { %v10_v1 = vld [vmem:[#allocation3] sm:$0x1]  }
   0xa   :  { %v7_v2 = vld [vmem:[#allocation3] sm:$0x1]   ;;  %11 = vrot.lane.b32.xlu0 %v10_v1, %s62_s0 }
   0xb   :  { %9 = vst.msk [vmem:[#allocation2] sm:$0x1] %vm8_vm0, %v7_v2  }
  0x7c   :  { %v12_v3 = vpop.permute.xlu0 %11  }
  0x7d   :  { %15 = vst.msk [vmem:[#allocation2 + $0x1] sm:$0x1] %vm8_vm0, %v12_v3  }
  0x84   :  { %v18_v4 = vld [vmem:[#allocation2] sm:$0x3] }
  0x85   :  { %21 = vst [vmem:[#allocation0] sm:$0x3] %v18_v4 }
  0x86   :  { %30 = dma.vmem_to_hbm [thread:$0]  %s26_s9, 32, %s28_s1, [#allocation1]  }
  0x87   :  { %60 = dma.done.wait [#allocation1], 32  }
  0x88   :  { %61 = vsyncadd [#allocation1], 4294967264 }
  0x89   :  { %33 = vsyncpa [#allocation1], 1 }

// kernel: policy_network_forward.1
= control target key start
LH: loop header
LB: loop body
LE: loop exit
PB: predicated region body
PF: predicated region fallthrough
CT: control target
= control target key end

     0   :  { %7 = vsyncpa [#allocation3], 0  ;;  %s245_s0 = inlined_call_operand.hbm [shape: f32[1,8], index: 0, kind: input, shape index: {}]   ;;  %s246_s1 = inlined_call_operand.hbm [shape: f32[96,128], index: 1, kind: input, shape index: {}]   ;;  %s247_s2 = inlined_call_operand.vmem [shape: f32[1,128], index: 2, kind: output, shape index: {}]  }
   0x1   :  { %s14_s11 = sshll.u32 %s245_s0, 4  ;;  %s15_s11 = int_to_ptr.hbm [resolvable:$true] %s14_s11 }
   0x2   :  { %8 = vsyncpa [#allocation5], 0  ;;  %s217_s12 = smov [#allocation2]   ;;  %s24_s16 = sshll.u32 %s246_s1, 4  ;;  %s25_s16 = int_to_ptr.hbm [resolvable:$true] %s24_s16 }
   0x3   :  { %s16_s13 = sshll.u32 %s217_s12, 4  ;;  %s218_s17 = smov [#allocation4]   ;;  %s17_s13 = int_to_ptr.vmem [resolvable:$true] %s16_s13 }
   0x4   :  { %19 = dma.hbm_to_vmem [thread:$0]  %s15_s11, 16, %s17_s13, [#allocation3]  }
   0x5   :  { %s26_s18 = sshll.u32 %s218_s17, 4  ;;  %s219_s19 = smov 128   ;;  %s27_s18 = int_to_ptr.vmem [resolvable:$true] %s26_s18 }
   0x6   :  { %s220_s20 = smov 8  }
   0x7   :  { %32 = dma.hbm_to_vmem [thread:$0]  %s25_s16, 1536, %s27_s18, [#allocation5], %s219_s19, %s219_s19, %s220_s20  }
   0x8   :  { %213 = dma.done.wait [#allocation3], 16  }
   0x9   :  { %214 = vsyncadd [#allocation3], 4294967280 }
   0xa   :  { %215 = dma.done.wait [#allocation5], 1536  }
   0xb   :  { %216 = vsyncadd [#allocation5], 4294965760  ;;  %vm44_vm0 = vcmask 64512   ;;  %v43_v0 = vld [vmem:[#allocation4] sm:$0xff]  ;;  %v41_v1 = vld [vmem:[#allocation2] sm:$0x1]  ;;  %v127_v23 = vlaneseq }
   0xc   :  { %v73_v2 = vld [vmem:[#allocation4 + $0x30] sm:$0xff]  ;;  %63 = vmatpush.msra.mxu0 %v43_v0  ;;  %v72_v3 = vld [vmem:[#allocation4 + $0x28] sm:$0xff]  ;;  %v71_v4 = vld [vmem:[#allocation4 + $0x20] sm:$0xff]  ;;  %vm74_vm1 = vcmask 326656  }
   0xd   :  { %89 = vmatpush.msra.mxu1 %v73_v2  ;;  %152 = vmatmul.msk.f32.vlgmr.msra.gmra.mxu0 %vm44_vm0, %v41_v1  ;;  %v70_v5 = vld [vmem:[#allocation4 + $0x18] sm:$0xff]  ;;  %v69_v6 = vld [vmem:[#allocation4 + $0x10] sm:$0xff]  ;;  %v101_v9 = vld [vmem:[#allocation4 + $0x48] sm:$0xff]  ;;  %v128_v25 = vand.u32 127, %v127_v23 }
   0xe   :  { %v103_v7 = vld [vmem:[#allocation4 + $0x58] sm:$0xff]  ;;  %v102_v8 = vld [vmem:[#allocation4 + $0x50] sm:$0xff]  ;;  %v42_v10 = vld [vmem:[#allocation4 + $0x8] sm:$0x1] }
   0xf   :  { %90 = vmatpush.msra.mxu1 %v72_v3  ;;  %118 = vmatpush.msra.mxu2 %v103_v7  ;;  %v100_v14 = vld [vmem:[#allocation4 + $0x40] sm:$0xff]  ;;  %v99_v15 = vld [vmem:[#allocation4 + $0x38] sm:$0xff]  ;;  %vm141_vm2 = vcmp.lt.s32.totalorder %v128_v25, 3  ;;  %vm142_vm3 = vcmp.eq.s32.totalorder %v128_v25, 5  ;;  %vm138_vm4 = vcmp.lt.s32.totalorder %v128_v25, 2 }
  0x10   :  { %vm143_vm5 = vmor %vm141_vm2, %vm142_vm3 }
  0x11   :  { %91 = vmatpush.msra.mxu1 %v71_v4  ;;  %119 = vmatpush.msra.mxu2 %v102_v8 }
  0x13   :  { %92 = vmatpush.msra.mxu1 %v70_v5  ;;  %120 = vmatpush.msra.mxu2 %v101_v9 }
  0x15   :  { %93 = vmatpush.msra.mxu1 %v69_v6  ;;  %121 = vmatpush.msra.mxu2 %v100_v14 }
  0x17   :  { %122 = vmatpush.msra.mxu2 %v99_v15 }
  0x8a   :  { %v65_v11 = vpop.f32.mrf.mxu0 }
  0x8b   :  { %v66_v12 = vadd.f32 %v65_v11, %v42_v10 }
  0x8d   :  { %v68_v13 = vmax.f32 %v66_v12, 0.0 }
  0x8f   :  { %153 = vmatmul.msk.f32.vlgmr.msra.gmra.mxu1 %vm74_vm1, %v68_v13 }
 0x10c   :  { %v95_v16 = vpop.f32.mrf.mxu1 }
 0x10d   :  { %v98_v17 = vmax.f32 %v95_v16, 0.0 }
 0x10f   :  { %154 = vmatmul.msk.f32.vlgmr.msra.gmra.mxu2 %vm74_vm1, %v98_v17 }
 0x192   :  { %v124_v18 = vpop.f32.mrf.mxu2 }
 0x193   :  { %v130_v19 = vand.u32 2147483647, %v124_v18  ;;  %v129_v27 = vmax.f32 %v124_v18, 0.0 }
 0x195   :  { %v131_v20 = vsub.f32 0.0, %v130_v19 }
 0x197   :  { %v132_v21 = vmul.f32 1.442695, %v131_v20 }
 0x199   :  { %159 = vpow2.f32 %v132_v21 }
 0x19f   :  { %v160_v22 = vpop.eup %159 }
 0x1a0   :  { %v134_v24 = vadd.f32 1.0, %v160_v22 }
 0x1a2   :  { %161 = vlog2.f32 %v134_v24 }
 0x1a3   :  { %163 = vtanh.f32 %v124_v18 }
 0x1a8   :  { %v162_v26 = vpop.eup %161 }
 0x1a9   :  { %v136_v28 = vmul.f32 0.6931472, %v162_v26  ;;  %v164_v30 = vpop.eup %163 }
 0x1ab   :  { %v137_v29 = vadd.f32 %v136_v28, %v129_v27 }
 0x1ad   :  { %v140_v31 = vsel %vm138_vm4, %v164_v30, %v137_v29 }
 0x1ae   :  { %v144_v32 = vsel %vm143_vm5, %v140_v31, 0.0 }
 0x1af   :  { %145 = vst [vmem:[%s247_s2] sm:$0x1] %v144_v32 }
 0x1b0   :  { %150 = vsyncpa [#allocation3], 1 }
 0x1b1   :  { %151 = vsyncpa [#allocation5], 1 }

</bundles_post_ra>
